<compile_context>
chip_gen: v5e
topology: v5e:2x2
jax: 0.10.0
libtpu: 0.0.40
codegen_flags: <defaults>
</compile_context>

<pallas_src>
import functools

import jax
import jax.numpy as jnp
from jax.experimental import pallas as pl
from jax.experimental.pallas import tpu as pltpu

# Protected-division threshold used by ops.Division().torch:
#   div(a, b) = a / b if b > DIV_THRESHOLD else 0
DIV_THRESHOLD = 1e-3


def _round_up(x, m):
    return ((x + m - 1) // m) * m


def _compute_batch_tile(batch, in_dim, itemsize=4):
    """Byte-budgeted batch tile, generation-aware caps.

    - ~6 MiB of x per block (Mosaic pads the minor dim to 128 lanes, which is
      what actually occupies VMEM when in_dim < 128), so the double-buffered
      x blocks (~12 MiB) + W + output fit v5e's 16 MiB scoped-VMEM default.
    - capped so large batches keep >= ~4 grid steps (v7x megacore needs >= 2
      blocks on the "parallel" axis to use both TensorCores).
    - multiple of 128 (lane-dense transposed output block; also satisfies the
      sublane-of-8 constraint on the x block), unless the whole batch fits in
      one block (block == full array dims is always legal).
    """
    row_bytes = _round_up(max(in_dim, 128), 128) * itemsize
    budget_per_block = 6 * 1024 * 1024
    tb = budget_per_block // row_bytes
    tb = min(tb, max(pl.cdiv(batch, 4), 128))
    tb = max(128, (tb // 128) * 128)
    if tb >= batch:
        return batch
    return tb


def div_layer_kernel(x_ref, wt_ref, o_ref, *, n_binary):
    """One batch tile: fused transposed matmul (MXU) + protected division.

    x_ref : (TB, in_dim)           input rows
    wt_ref: (2*n_binary, in_dim)   rows [Wn ; Wd] (numerators then denominators)
    o_ref : (n_binary, TB)         lane-dense transposed output block
    """
    x = x_ref[...]
    wt = wt_ref[...]
    # Attention-style A @ B.T MXU pattern: result is already transposed
    # (2*n_binary, TB), so the store below is lane-dense (TB on lanes).
    gT = jnp.dot(wt, x.T, preferred_element_type=jnp.float32)
    num = gT[:n_binary, :]
    den = gT[n_binary:, :]
    mask = den > DIV_THRESHOLD
    # Safe denominator so the unselected branch never computes inf/nan.
    den_safe = jnp.where(mask, den, jnp.ones_like(den))
    out = jnp.where(mask, num / den_safe, jnp.zeros_like(num))
    o_ref[...] = out.astype(o_ref.dtype)


def div_layer_forward(x, W, *, n_unary=0, n_binary=1):
    """Pallas wrapper reproducing DivLayer.forward for division-only fct lists."""
    assert n_unary == 0, "default_divLayer has no unary fcts"
    batch, in_dim = x.shape
    out_dim = n_unary + 2 * n_binary
    assert W.shape == (in_dim, out_dim)

    # Tiny weight reshuffle in the wrapper: interleaved (num0, den0, num1, ...)
    # columns -> contiguous [Wn ; Wd] rows of shape (2*n_binary, in_dim), so
    # the in-kernel split of gT is a contiguous sublane slice.
    Wn = W[:, 0::2].T                       # (n_binary, in_dim) numerators
    Wd = W[:, 1::2].T                       # (n_binary, in_dim) denominators
    WT = jnp.concatenate([Wn, Wd], axis=0)  # (2*n_binary, in_dim)

    itemsize = x.dtype.itemsize
    tb = _compute_batch_tile(batch, in_dim, itemsize)
    grid = (pl.cdiv(batch, tb),)

    flops = 4 * batch * in_dim * n_binary + 4 * batch * n_binary
    bytes_accessed = (batch * in_dim * itemsize
                      + 2 * n_binary * in_dim * itemsize
                      + batch * n_binary * itemsize)

    out_t = pl.pallas_call(
        functools.partial(div_layer_kernel, n_binary=n_binary),
        out_shape=jax.ShapeDtypeStruct((n_binary, batch), x.dtype),
        grid=grid,
        in_specs=[
            pl.BlockSpec((tb, in_dim), lambda i: (i, 0)),
            pl.BlockSpec((2 * n_binary, in_dim), lambda i: (0, 0)),
        ],
        out_specs=pl.BlockSpec((n_binary, tb), lambda i: (0, i)),
        compiler_params=pltpu.CompilerParams(
            dimension_semantics=("parallel",),
            vmem_limit_bytes=32 * 1024 * 1024,
        ),
        cost_estimate=pl.CostEstimate(
            flops=flops,
            transcendentals=batch * n_binary,
            bytes_accessed=bytes_accessed,
        ),
    )(x, WT)
    # Tiny (n_binary, batch) -> (batch, n_binary) transpose on the result.
    return out_t.T


def div_layer_reference(x, W, *, n_unary=0, n_binary=1):
    """Pure-JAX reference mirroring the PyTorch forward loop."""
    g = x @ W
    outs = []
    in_i = n_unary
    for _ in range(n_binary):
        a = g[:, in_i]
        b = g[:, in_i + 1]
        outs.append(jnp.where(b > DIV_THRESHOLD, a / b, 0.0))
        in_i += 2
    return jnp.stack(outs, axis=1)


if __name__ == "__main__":
    # --- Test 1: module-default shapes (one binary division fct) ------------
    key = jax.random.PRNGKey(0)
    k_x, k_w = jax.random.split(key)
    batch, in_dim, n_binary = 8, 32, 1
    # Deterministic init mirroring torch.normal(mean=0, std=0.1, size=(in_dim, out_dim)).
    W = 0.1 * jax.random.normal(k_w, (in_dim, 2 * n_binary), dtype=jnp.float32)
    x = jax.random.normal(k_x, (batch, in_dim), dtype=jnp.float32)

    out = jax.block_until_ready(div_layer_forward(x, W, n_binary=n_binary))
    ref = div_layer_reference(x, W, n_binary=n_binary)
    assert out.shape == (batch, n_binary)
    assert jnp.allclose(out, ref, atol=1e-3, rtol=5e-3)

    # --- Test 2: multi-block grid, ragged batch, two division fcts ----------
    k1, k2, k3 = jax.random.split(jax.random.PRNGKey(0), 3)
    b2, d2, nb2 = 300, 20, 2
    x2 = jnp.abs(jax.random.normal(k1, (b2, d2), dtype=jnp.float32)) + 0.1
    Wnum = 0.1 * jax.random.normal(k2, (d2, nb2), dtype=jnp.float32)
    # Positive denominator weights keep denominators well above the protected
    # threshold, so the comparison is not sensitive to matmul rounding.
    Wden = 0.05 + 0.1 * jnp.abs(jax.random.normal(k3, (d2, nb2), dtype=jnp.float32))
    W2 = jnp.stack([Wnum[:, 0], Wden[:, 0], Wnum[:, 1], Wden[:, 1]], axis=1)

    out2 = jax.block_until_ready(div_layer_forward(x2, W2, n_binary=nb2))
    ref2 = div_layer_reference(x2, W2, n_binary=nb2)
    assert out2.shape == (b2, nb2)
    assert jnp.allclose(out2, ref2, atol=2e-3, rtol=1e-2)

    print("KERNEL_OK")
</pallas_src>

<mosaic_0001>
module attributes {stable_mosaic.version = 11 : i64} {
  func.func @div_layer_kernel(%arg0: i32, %arg1: memref<8x32xf32, #tpu.memory_space<vmem>>, %arg2: memref<2x32xf32, #tpu.memory_space<vmem>>, %arg3: memref<1x8xf32, #tpu.memory_space<vmem>>) attributes {dimension_semantics = [#tpu.dimension_semantics<parallel>], iteration_bounds = array<i64: 1>, scalar_prefetch = 0 : i64, scratch_operands = 0 : i64, tpu.core_type = #tpu.core_type<tc>, window_params = [{transform_indices = @transform_0, window_bounds = array<i64: 8, 32>}, {pipeline_mode = #tpu.pipeline_mode<synchronous>, transform_indices = @transform_1, window_bounds = array<i64: 2, 32>}, {transform_indices = @transform_2, window_bounds = array<i64: 1, 8>}]} {
    %c0 = arith.constant 0 : index
    %c0_0 = arith.constant 0 : index
    %0 = vector.load %arg1[%c0, %c0_0] : memref<8x32xf32, #tpu.memory_space<vmem>>, vector<8x32xf32>
    %c0_1 = arith.constant 0 : index
    %c0_2 = arith.constant 0 : index
    %1 = vector.load %arg2[%c0_1, %c0_2] : memref<2x32xf32, #tpu.memory_space<vmem>>, vector<2x32xf32>
    %2 = tpu.transpose %0, [1, 0] : vector<8x32xf32> -> vector<32x8xf32>
    %cst = arith.constant dense<0.000000e+00> : vector<2x8xf32>
    %3 = tpu.matmul %1, %2, %cst {dimension_numbers = #tpu.dot_dimension_numbers<[1], [0], [0], [1], [0, 0, 1, 1], [], []>} : vector<2x32xf32>, vector<32x8xf32>, vector<2x8xf32> -> vector<2x8xf32>
    %4 = vector.extract_strided_slice %3 {offsets = [0, 0], sizes = [1, 8], strides = [1, 1]} : vector<2x8xf32> to vector<1x8xf32>
    %5 = vector.extract_strided_slice %3 {offsets = [1, 0], sizes = [1, 8], strides = [1, 1]} : vector<2x8xf32> to vector<1x8xf32>
    %cst_3 = arith.constant 1.000000e-03 : f32
    %6 = vector.broadcast %cst_3 : f32 to vector<1x8xf32>
    %7 = arith.cmpf ogt, %5, %6 : vector<1x8xf32>
    %cst_4 = arith.constant 1.000000e+00 : f32
    %8 = vector.broadcast %cst_4 : f32 to vector<1x8xf32>
    %9 = arith.select %7, %5, %8 : vector<1x8xi1>, vector<1x8xf32>
    %10 = arith.divf %4, %9 : vector<1x8xf32>
    %cst_5 = arith.constant 0.000000e+00 : f32
    %11 = vector.broadcast %cst_5 : f32 to vector<1x8xf32>
    %12 = arith.select %7, %10, %11 : vector<1x8xi1>, vector<1x8xf32>
    %c0_6 = arith.constant 0 : index
    %c0_7 = arith.constant 0 : index
    %13 = vector.load %arg3[%c0_6, %c0_7] : memref<1x8xf32, #tpu.memory_space<vmem>>, vector<1x8xf32>
    tpu.vector_store %arg3[%c0_6, %c0_7], %12 {strides = array<i32>} : memref<1x8xf32, #tpu.memory_space<vmem>>, vector<1x8xf32>,
    return
  }
  func.func @transform_0(%arg0: i32) -> (i32, i32) {
    %c0_i32 = arith.constant 0 : i32
    %c0_i32_0 = arith.constant 0 : i32
    return %arg0, %c0_i32 : i32, i32
  }
  func.func @transform_1(%arg0: i32) -> (i32, i32) {
    %c0_i32 = arith.constant 0 : i32
    %c0_i32_0 = arith.constant 0 : i32
    %c0_i32_1 = arith.constant 0 : i32
    return %c0_i32, %c0_i32_0 : i32, i32
  }
  func.func @transform_2(%arg0: i32) -> (i32, i32) {
    %c0_i32 = arith.constant 0 : i32
    %c0_i32_0 = arith.constant 0 : i32
    return %c0_i32, %arg0 : i32, i32
  }
}

</mosaic_0001>

<bundles_post_ra>
// kernel: tpu_custom_call.1
= control target key start
LH: loop header
LB: loop body
LE: loop exit
PB: predicated region body
PF: predicated region fallthrough
CT: control target
= control target key end

     0   :  { %7 = vsyncpa [#allocation3], 0  ;;  %s227_s0 = inlined_call_operand.hbm [shape: f32[8,32], index: 0, kind: input, shape index: {}]   ;;  %s228_s1 = inlined_call_operand.hbm [shape: f32[2,32], index: 1, kind: input, shape index: {}]   ;;  %s229_s2 = inlined_call_operand.hbm [shape: f32[1,8], index: 2, kind: output, shape index: {}]  }
   0x1   :  { %8 = vsyncpa [#allocation6], 0 }
   0x2   :  { %9 = vsyncpa [#allocation4], 0  ;;  %s15_s11 = sshll.u32 %s227_s0, 4  ;;  %s198_s12 = smov [#allocation2]   ;;  %s16_s11 = int_to_ptr.hbm [resolvable:$true] %s15_s11 }
   0x3   :  { %s17_s13 = sshll.u32 %s198_s12, 4  ;;  %s26_s16 = sshll.u32 %s228_s1, 4  ;;  %s18_s13 = int_to_ptr.vmem [resolvable:$true] %s17_s13  ;;  %s27_s16 = int_to_ptr.hbm [resolvable:$true] %s26_s16 }
   0x4   :  { %20 = dma.hbm_to_vmem [thread:$0]  %s16_s11, 128, %s18_s13, [#allocation3]  }
   0x5   :  { %s199_s17 = smov [#allocation5]  }
   0x6   :  { %s28_s18 = sshll.u32 %s199_s17, 4  ;;  %s29_s18 = int_to_ptr.vmem [resolvable:$true] %s28_s18 }
   0x7   :  { %31 = dma.hbm_to_vmem [thread:$0]  %s27_s16, 32, %s29_s18, [#allocation6]  }
   0x8   :  { %192 = dma.done.wait [#allocation3], 128  }
   0x9   :  { %193 = vsyncadd [#allocation3], 4294967168 }
   0xa   :  { %194 = dma.done.wait [#allocation6], 32  }
   0xb   :  { %195 = vsyncadd [#allocation6], 4294967264  ;;  %vm42_vm0 = vcmask 261120   ;;  %v40_v0 = vld [vmem:[#allocation2] sm:$0xff]  ;;  %v41_v1 = vld [vmem:[#allocation5] sm:$0x3] }
   0xc   :  { %113 = vmatpush.xpose.msk.msra.mxu0 %vm42_vm0, %v40_v0  ;;  %s200_s0 = smov [#allocation7]   ;;  %s102_s21 = sshll.u32 %s229_s2, 4  ;;  %vm93_vm6 = vcmask 58369   ;;  %s103_s21 = int_to_ptr.hbm [resolvable:$true] %s102_s21 }
   0xd   :  { %s100_s1 = sshll.u32 %s200_s0, 4  ;;  %s101_s1 = int_to_ptr.vmem [resolvable:$true] %s100_s1 }
   0xf   :  { %114 = vmatmul.msk.f32.vlgmr.msra.gmra.mxu0 %vm42_vm0, %v41_v1 }
  0x8c   :  { %v66_v2 = vpop.f32.mrf.mxu0 }
  0x8d   :  { %vm69_vm1 = vcmp.gt.f32.partialorder %v66_v2, 0.001 }
  0x8e   :  { %v70_v3 = vsel %vm69_vm1, %v66_v2, 1.0 }
  0x8f   :  { %v72_v4 = vrot.slane %v70_v3, 1 }
  0x91   :  { %118 = vrcp.f32 %v72_v4  ;;  %v85_v8 = vand.u32 2147483648, %v72_v4  ;;  %v83_v10 = vand.u32 2147483647, %v72_v4  ;;  %vm79_vm3 = vweird.f32 %v72_v4 }
  0x93   :  { %v86_v12 = vor.u32 1.1754944e-38, %v85_v8  ;;  %vm84_vm5 = vcmp.eq.f32.partialorder %v83_v10, 8.507059e+37 }
  0x97   :  { %v119_v5 = vpop.eup %118 }
  0x98   :  { %v75_v6 = vmul.f32 %v119_v5, %v72_v4  ;;  %vm80_vm2 = vweird.f32 %v119_v5 }
  0x99   :  { %vm81_vm4 = vmor %vm79_vm3, %vm80_vm2 }
  0x9a   :  { %v76_v7 = vsub.f32 1.0, %v75_v6 }
  0x9c   :  { %v77_v9 = vmul.f32 %v119_v5, %v76_v7 }
  0x9e   :  { %v78_v11 = vadd.f32 %v119_v5, %v77_v9 }
  0xa0   :  { %v82_v13 = vsel %vm81_vm4, %v119_v5, %v78_v11 }
  0xa1   :  { %v87_v14 = vsel %vm84_vm5, %v86_v12, %v82_v13 }
  0xa2   :  { %v88_v15 = vmul.f32 %v87_v14, %v66_v2 }
  0xa4   :  { %v90_v16 = vrot.slane %v88_v15, 7 }
  0xa6   :  { %v92_v17 = vsel %vm69_vm1, %v90_v16, 0.0 }
  0xa7   :  { %94 = vst.msk [vmem:[#allocation7 - $0x1] sm:$0x2] %vm93_vm6, %v92_v17 }
  0xa8   :  { %105 = dma.vmem_to_hbm [thread:$0]  %s101_s1, 16, %s103_s21, [#allocation4]  }
  0xa9   :  { %196 = dma.done.wait [#allocation4], 16  }
  0xaa   :  { %197 = vsyncadd [#allocation4], 4294967280 }
  0xab   :  { %110 = vsyncpa [#allocation3], 1 }
  0xac   :  { %111 = vsyncpa [#allocation6], 1 }
  0xad   :  { %112 = vsyncpa [#allocation4], 1 }

</bundles_post_ra>
